<compile_context>
chip_gen: v7x
topology: tpu7x:2x2x1
jax: 0.10.0
libtpu: 0.0.40
codegen_flags: <defaults>
</compile_context>

<pallas_src>
import functools

import jax
import jax.numpy as jnp
from jax import lax
from jax.experimental import pallas as pl
from jax.experimental.pallas import tpu as pltpu

EPS = 1e-5                      # torch.nn.LayerNorm default eps

# VMEM working-set budget used when auto-shrinking the row tile.  56 MiB leaves
# DMA headroom under v7x's 64 MiB physical VMEM; on v5e/v6e (128 MiB physical)
# this can be raised toward ~100 MiB for even larger row tiles.
_VMEM_BUDGET = 56 * 1024 * 1024
_VMEM_MARGIN = 8 * 1024 * 1024  # headroom for compiler-internal scratch


def _cdiv(a, b):
    return -(-a // b)


def _round_up(a, b):
    return _cdiv(a, b) * b


# ----------------------------- fused TDS block kernel ------------------------


def _tds_block_kernel(xm_ref, xh_ref, w_ref, cb_ref, g1_ref, be1_ref,
                      w1_ref, fb1_ref, w2_ref, fb2_ref, g2_ref, be2_ref,
                      o_ref, win_ref, *, kernel_width, shift_rows, halo_rows,
                      mm_dtype):
    """Fused TDSConv2dBlock + TDSFullyConnectedBlock on one (tile, F) row tile.

    xm_ref : (tile, F)      main input rows (flattened (t, n), channels-major F)
    xh_ref : (halo_blk, F)  halo rows: the next (K-1)*N input rows after the tile
    w_ref  : (K, F, F)      per-tap channel-mixing matrices, kron(conv_w[:,:,k], I_W)
    cb/g1/be1, fb1/fb2, g2/be2 : (1, F) conv bias, LN1 params, FC biases, LN2 params
    w1_ref, w2_ref : (F, F) transposed FC weights
    o_ref  : (tile, F)
    win_ref: (tile + halo_rows, F) scratch (MXU dtype) holding the conv window
    """
    tile, f = o_ref.shape

    # Assemble the overlapping conv window once, casting to the MXU dtype a
    # single time (instead of K per-tap full-tile casts).
    win_ref[0:tile, :] = xm_ref[...].astype(win_ref.dtype)
    if halo_rows > 0:
        win_ref[tile:tile + halo_rows, :] = xh_ref[0:halo_rows, :].astype(win_ref.dtype)

    # Temporal conv: K channel-mixing (F, F) matmuls over shifted windows,
    # f32 accumulation on the MXU.
    acc = jnp.zeros((tile, f), jnp.float32)
    for k in range(kernel_width):            # static unroll over temporal taps
        a_k = win_ref[k * shift_rows:k * shift_rows + tile, :]
        acc = acc + jnp.dot(a_k, w_ref[k], preferred_element_type=jnp.float32)
    acc = jnp.maximum(acc + cb_ref[...], 0.0)            # conv bias + ReLU

    # Residual = inputs[-T_out:], sourced from the untouched input refs (NOT the
    # bf16 window scratch) so the residual path is not double-rounded.
    if halo_rows > 0:
        res = jnp.concatenate(
            [xm_ref[halo_rows:tile, :], xh_ref[0:halo_rows, :]], axis=0)
    else:
        res = xm_ref[...]
    z = acc + res.astype(jnp.float32)

    # LayerNorm #1 over the feature (lane) axis, f32.
    # TODO(synk): if production F is not a multiple of 128, pad F in
    # prepare_params and compute LN from sum / sum-of-squares with an explicit
    # 1/F constant to keep stores unmasked.
    mean = jnp.mean(z, axis=-1, keepdims=True)
    zc = z - mean
    var = jnp.mean(zc * zc, axis=-1, keepdims=True)
    y = zc * lax.rsqrt(var + EPS) * g1_ref[...] + be1_ref[...]

    # Fused fully-connected block: Linear -> ReLU -> Linear -> residual -> LN.
    h = jnp.dot(y.astype(mm_dtype), w1_ref[...],
                preferred_element_type=jnp.float32) + fb1_ref[...]
    h = jnp.maximum(h, 0.0)
    ff = jnp.dot(h.astype(mm_dtype), w2_ref[...],
                 preferred_element_type=jnp.float32) + fb2_ref[...]
    z2 = ff + y
    mean2 = jnp.mean(z2, axis=-1, keepdims=True)
    z2c = z2 - mean2
    var2 = jnp.mean(z2c * z2c, axis=-1, keepdims=True)
    out = z2c * lax.rsqrt(var2 + EPS) * g2_ref[...] + be2_ref[...]
    o_ref[...] = out.astype(o_ref.dtype)


# ----------------------------- pallas_call wrapper ---------------------------


def _block_vmem_bytes(tile, halo, halo_blk, f, kw, in_bytes, out_bytes, mm_bytes):
    """Estimate the VMEM working set of one fused TDS block call."""
    need = 2 * tile * f * in_bytes          # main input tile (double-buffered)
    need += 2 * halo_blk * f * in_bytes     # halo tile (double-buffered)
    need += 2 * tile * f * out_bytes        # output tile (double-buffered)
    need += kw * f * f * mm_bytes           # conv taps (single resident copy)
    need += 2 * f * f * mm_bytes            # FC weights (single resident copies)
    need += 8 * f * 4                       # biases / LN params
    need += (tile + halo) * f * mm_bytes    # conv window scratch
    return need


def tds_block_pallas(x2d, conv_p, fc_p, *, kernel_width, n_batch, mm_dtype,
                     out_dtype, target_tile=1024):
    """x2d: (T_in*N, F) rows ordered (t, n). Returns (T_out*N, F) in out_dtype."""
    r_in, f = x2d.shape
    kw = kernel_width
    shift = n_batch                       # rows per time step
    halo = (kw - 1) * shift               # extra input rows a tile needs
    r_out = r_in - halo
    assert r_out > 0, "sequence shorter than the conv kernel"

    in_bytes = x2d.dtype.itemsize
    out_bytes = jnp.dtype(out_dtype).itemsize
    mm_bytes = jnp.dtype(mm_dtype).itemsize

    # TODO(synk): when (K-1)*N approaches the target tile (large batch on v7x),
    # keep the input 3-D (t, n, F) and add an n-tile grid axis so the halo is
    # (K-1)*n_tile rows instead of (K-1)*N.
    halo_blk = max(8, _round_up(halo, 8))       # sublane-aligned halo block
    tile = max(halo_blk, (max(target_tile, halo_blk) // halo_blk) * halo_blk)
    tile = min(tile, _round_up(r_out, halo_blk))
    # Shrink the row tile until the estimated working set fits the VMEM budget.
    while (tile > halo_blk and
           _block_vmem_bytes(tile, halo, halo_blk, f, kw,
                             in_bytes, out_bytes, mm_bytes) > _VMEM_BUDGET):
        tile -= halo_blk

    num_tiles = _cdiv(r_out, tile)
    r_out_pad = num_tiles * tile
    need_rows = r_out_pad + halo_blk
    if need_rows > r_in:
        x2d = jnp.pad(x2d, ((0, need_rows - r_in), (0, 0)))
    m = tile // halo_blk                  # halo block-index stride

    need = _block_vmem_bytes(tile, halo, halo_blk, f, kw,
                             in_bytes, out_bytes, mm_bytes)
    vmem_limit = max(need + _VMEM_MARGIN, 32 * 1024 * 1024)

    kern = functools.partial(
        _tds_block_kernel, kernel_width=kw, shift_rows=shift,
        halo_rows=halo, mm_dtype=mm_dtype)

    # Grid-invariant operands: one resident VMEM copy, no double-buffering.
    # TODO(synk): on v7x at production K,F (~36 MiB of conv taps) stream w_exp
    # tap-by-tap instead, via a second ("arbitrary") reduction grid axis with a
    # ((1, F, F), lambda i, k: (k, 0, 0)) BlockSpec and a (tile, F) f32
    # accumulator scratch initialized/finalized with pl.when.
    resident = pl.BlockSpec(memory_space=pltpu.VMEM)

    out = pl.pallas_call(
        kern,
        out_shape=jax.ShapeDtypeStruct((r_out_pad, f), out_dtype),
        grid=(num_tiles,),
        in_specs=[
            # main rows of tile i
            pl.BlockSpec((tile, f), lambda i: (i, 0)),
            # halo rows: the rows right after tile i (second view of x2d)
            pl.BlockSpec((halo_blk, f), lambda i: ((i + 1) * m, 0)),
            resident,   # w_exp (K, F, F)
            resident,   # conv bias
            resident,   # LN1 gamma
            resident,   # LN1 beta
            resident,   # FC w1^T
            resident,   # FC b1
            resident,   # FC w2^T
            resident,   # FC b2
            resident,   # LN2 gamma
            resident,   # LN2 beta
        ],
        out_specs=pl.BlockSpec((tile, f), lambda i: (i, 0)),
        scratch_shapes=[pltpu.VMEM((tile + halo, f), mm_dtype)],
        compiler_params=pltpu.CompilerParams(
            # TODO(synk): on v7x use pltpu.CORE_PARALLEL here so independent row
            # tiles are sharded across the chip's two TensorCores.
            dimension_semantics=("parallel",),
            vmem_limit_bytes=vmem_limit),
    )(x2d, x2d,
      conv_p["w_exp"], conv_p["bias"], conv_p["ln_g"], conv_p["ln_b"],
      fc_p["w1t"], fc_p["b1"], fc_p["w2t"], fc_p["b2"], fc_p["ln_g"], fc_p["ln_b"])
    return out[:r_out]


# ----------------------------- parameter prep + forward ----------------------


def prepare_params(params, num_features, mm_dtype):
    """Precompute kernel-ready weights once (expanded conv taps, transposed FC
    weights, reshaped biases / LN params) instead of per forward call."""
    prepared = []
    for p in params:
        cp, fp = p["conv"], p["fc"]
        c, _, kw = cp["conv_w"].shape
        w = num_features // c
        eye = jnp.eye(w, dtype=jnp.float32)
        # w_exp[k, i*W + u, o*W + v] = conv_w[o, i, k] * delta(u, v)
        # (channels-major feature layout f = c*W + w, matching the torch reshape)
        # TODO(synk): this kron-identity expansion inflates conv MXU FLOPs and
        # weight bytes by W=F/C at production shapes; if profiling shows the conv
        # dominates, fold W into the row dimension and contract over C*K instead.
        w_exp = jnp.einsum("oik,uv->kiuov", cp["conv_w"], eye)
        w_exp = w_exp.reshape(kw, num_features, num_features).astype(mm_dtype)
        conv = {
            "kernel_width": kw,
            "w_exp": w_exp,
            "bias": jnp.repeat(cp["conv_b"], w).reshape(1, num_features),
            "ln_g": cp["ln_g"].reshape(1, num_features),
            "ln_b": cp["ln_b"].reshape(1, num_features),
        }
        fc = {
            "w1t": fp["w1"].T.astype(mm_dtype),   # torch Linear: y = x @ W.T + b
            "b1": fp["b1"].reshape(1, num_features),
            "w2t": fp["w2"].T.astype(mm_dtype),
            "b2": fp["b2"].reshape(1, num_features),
            "ln_g": fp["ln_g"].reshape(1, num_features),
            "ln_b": fp["ln_b"].reshape(1, num_features),
        }
        prepared.append({"conv": conv, "fc": fc, "mm_dtype": mm_dtype})
    return prepared


def tds_conv_encoder_forward(prepared, x):
    t, n, f = x.shape
    h = x.reshape(t * n, f)
    num_blocks = len(prepared)
    for bi, p in enumerate(prepared):
        last = bi == num_blocks - 1
        # bf16 inter-block activations halve HBM writeback and the next block's
        # input DMA; only the encoder's final output stays f32.  In the f32
        # structural-check mode everything stays f32.
        if p["mm_dtype"] == jnp.float32 or last:
            out_dtype = jnp.float32
        else:
            out_dtype = jnp.bfloat16
        h = tds_block_pallas(
            h, p["conv"], p["fc"],
            kernel_width=p["conv"]["kernel_width"], n_batch=n,
            mm_dtype=p["mm_dtype"], out_dtype=out_dtype)
    t_out = h.shape[0] // n
    return h.reshape(t_out, n, f)


# ----------------------------- params + pure-JAX reference -------------------


def init_params(key, num_features, block_channels, kernel_width):
    params = []
    for channels in block_channels:
        assert num_features % channels == 0
        key, *ks = jax.random.split(key, 11)
        conv = {
            "conv_w": jax.random.normal(
                ks[0], (channels, channels, kernel_width), jnp.float32)
            * (1.0 / (channels * kernel_width) ** 0.5),
            "conv_b": 0.1 * jax.random.normal(ks[1], (channels,), jnp.float32),
            "ln_g": 1.0 + 0.1 * jax.random.normal(ks[2], (num_features,), jnp.float32),
            "ln_b": 0.05 * jax.random.normal(ks[3], (num_features,), jnp.float32),
        }
        fc = {
            "w1": jax.random.normal(ks[4], (num_features, num_features), jnp.float32)
            * (1.0 / num_features ** 0.5),
            "b1": 0.1 * jax.random.normal(ks[5], (num_features,), jnp.float32),
            "w2": jax.random.normal(ks[6], (num_features, num_features), jnp.float32)
            * (1.0 / num_features ** 0.5),
            "b2": 0.1 * jax.random.normal(ks[7], (num_features,), jnp.float32),
            "ln_g": 1.0 + 0.1 * jax.random.normal(ks[8], (num_features,), jnp.float32),
            "ln_b": 0.05 * jax.random.normal(ks[9], (num_features,), jnp.float32),
        }
        params.append({"conv": conv, "fc": fc})
    return params


def _ref_layernorm(x, g, b):
    m = jnp.mean(x, axis=-1, keepdims=True)
    v = jnp.mean((x - m) ** 2, axis=-1, keepdims=True)
    return (x - m) * lax.rsqrt(v + EPS) * g + b


def ref_forward(params, x):
    for p in params:
        cp, fp = p["conv"], p["fc"]
        c = cp["conv_w"].shape[0]
        kw = cp["conv_w"].shape[-1]
        t_in, n, f = x.shape
        w = f // c
        t_out = t_in - kw + 1
        xi = x.reshape(t_in, n, c, w)
        y = jnp.zeros((t_out, n, c, w), jnp.float32)
        for k in range(kw):
            y = y + jnp.einsum("oi,tniw->tnow", cp["conv_w"][:, :, k], xi[k:k + t_out])
        y = y + cp["conv_b"][None, None, :, None]
        y = jnp.maximum(y, 0.0).reshape(t_out, n, f)
        y = y + x[t_in - t_out:]
        y = _ref_layernorm(y, cp["ln_g"], cp["ln_b"])
        h = jnp.maximum(y @ fp["w1"].T + fp["b1"], 0.0)
        z = h @ fp["w2"].T + fp["b2"]
        x = _ref_layernorm(z + y, fp["ln_g"], fp["ln_b"])
    return x


# ----------------------------- main -------------------------------------------


if __name__ == "__main__":
    T, N = 16, 2
    num_features = 16          # channels * width = 4 * 4
    block_channels = (4, 4)
    kernel_width = 5

    key = jax.random.PRNGKey(0)
    key, kx, kp = jax.random.split(key, 3)
    x = jax.random.normal(kx, (T, N, num_features), jnp.float32)
    params = init_params(kp, num_features, block_channels, kernel_width)
    expected_t = T - len(block_channels) * (kernel_width - 1)

    # --- structural / indexing check (tight tolerance, pure f32 path) ---------
    # Inputs & weights are rounded to bf16-representable f32 values so that every
    # MXU product is exact regardless of the matmul precision mode; any mismatch
    # beyond 1e-4 would therefore indicate a layout / indexing / fusion bug.
    rnd = lambda a: a.astype(jnp.bfloat16).astype(jnp.float32)
    x_r = rnd(x)
    params_r = jax.tree_util.tree_map(rnd, params)
    out_f32 = tds_conv_encoder_forward(
        prepare_params(params_r, num_features, jnp.float32), x_r)
    out_f32 = jax.block_until_ready(out_f32)
    ref_f32 = ref_forward(params_r, x_r)
    assert out_f32.shape == (expected_t, N, num_features), out_f32.shape
    assert jnp.allclose(out_f32, ref_f32, atol=1e-4, rtol=1e-4), (
        "f32 structural check failed: max abs err "
        f"{float(jnp.max(jnp.abs(out_f32 - ref_f32)))}")

    # --- performance-mode check (bf16 MXU operands / inter-block activations) -
    out_bf16 = tds_conv_encoder_forward(
        prepare_params(params, num_features, jnp.bfloat16), x)
    out_bf16 = jax.block_until_ready(out_bf16)
    ref = ref_forward(params, x)
    assert out_bf16.shape == (expected_t, N, num_features), out_bf16.shape
    assert jnp.allclose(out_bf16, ref, atol=5e-2, rtol=5e-2), (
        "bf16 check failed: max abs err "
        f"{float(jnp.max(jnp.abs(out_bf16 - ref)))}")

    print("KERNEL_OK")
</pallas_src>

<mosaic_0001>
module attributes {stable_mosaic.version = 11 : i64} {
  func.func @_tds_block_kernel(%arg0: i32, %arg1: memref<24x16xf32, #tpu.memory_space<vmem>>, %arg2: memref<8x16xf32, #tpu.memory_space<vmem>>, %arg3: memref<5x16x16xf32, #tpu.memory_space<vmem>>, %arg4: memref<1x16xf32, #tpu.memory_space<vmem>>, %arg5: memref<1x16xf32, #tpu.memory_space<vmem>>, %arg6: memref<1x16xf32, #tpu.memory_space<vmem>>, %arg7: memref<16x16xf32, #tpu.memory_space<vmem>>, %arg8: memref<1x16xf32, #tpu.memory_space<vmem>>, %arg9: memref<16x16xf32, #tpu.memory_space<vmem>>, %arg10: memref<1x16xf32, #tpu.memory_space<vmem>>, %arg11: memref<1x16xf32, #tpu.memory_space<vmem>>, %arg12: memref<1x16xf32, #tpu.memory_space<vmem>>, %arg13: memref<24x16xf32, #tpu.memory_space<vmem>>, %arg14: memref<32x16xf32, #tpu.memory_space<vmem>>) attributes {dimension_semantics = [#tpu.dimension_semantics<parallel>], iteration_bounds = array<i64: 1>, scalar_prefetch = 0 : i64, scratch_operands = 1 : i64, tpu.core_type = #tpu.core_type<tc>, window_params = [{transform_indices = @transform_0, window_bounds = array<i64: 24, 16>}, {transform_indices = @transform_1, window_bounds = array<i64: 8, 16>}, {pipeline_mode = #tpu.pipeline_mode<synchronous>, transform_indices = @transform_2, window_bounds = array<i64: 5, 16, 16>}, {pipeline_mode = #tpu.pipeline_mode<synchronous>, transform_indices = @transform_3, window_bounds = array<i64: 1, 16>}, {pipeline_mode = #tpu.pipeline_mode<synchronous>, transform_indices = @transform_4, window_bounds = array<i64: 1, 16>}, {pipeline_mode = #tpu.pipeline_mode<synchronous>, transform_indices = @transform_5, window_bounds = array<i64: 1, 16>}, {pipeline_mode = #tpu.pipeline_mode<synchronous>, transform_indices = @transform_6, window_bounds = array<i64: 16, 16>}, {pipeline_mode = #tpu.pipeline_mode<synchronous>, transform_indices = @transform_7, window_bounds = array<i64: 1, 16>}, {pipeline_mode = #tpu.pipeline_mode<synchronous>, transform_indices = @transform_8, window_bounds = array<i64: 16, 16>}, {pipeline_mode = #tpu.pipeline_mode<synchronous>, transform_indices = @transform_9, window_bounds = array<i64: 1, 16>}, {pipeline_mode = #tpu.pipeline_mode<synchronous>, transform_indices = @transform_10, window_bounds = array<i64: 1, 16>}, {pipeline_mode = #tpu.pipeline_mode<synchronous>, transform_indices = @transform_11, window_bounds = array<i64: 1, 16>}, {transform_indices = @transform_12, window_bounds = array<i64: 24, 16>}]} {
    %c0 = arith.constant 0 : index
    %c0_0 = arith.constant 0 : index
    %0 = vector.load %arg1[%c0, %c0_0] : memref<24x16xf32, #tpu.memory_space<vmem>>, vector<24x16xf32>
    %c0_1 = arith.constant 0 : index
    %c0_2 = arith.constant 0 : index
    %1 = vector.load %arg14[%c0_1, %c0_2] : memref<32x16xf32, #tpu.memory_space<vmem>>, vector<24x16xf32>
    tpu.vector_store %arg14[%c0_1, %c0_2], %0 {strides = array<i32>} : memref<32x16xf32, #tpu.memory_space<vmem>>, vector<24x16xf32>,
    %c0_3 = arith.constant 0 : index
    %c0_4 = arith.constant 0 : index
    %2 = vector.load %arg2[%c0_3, %c0_4] : memref<8x16xf32, #tpu.memory_space<vmem>>, vector<8x16xf32>
    %c24 = arith.constant 24 : index
    %c0_5 = arith.constant 0 : index
    %3 = vector.load %arg14[%c24, %c0_5] : memref<32x16xf32, #tpu.memory_space<vmem>>, vector<8x16xf32>
    tpu.vector_store %arg14[%c24, %c0_5], %2 {strides = array<i32>} : memref<32x16xf32, #tpu.memory_space<vmem>>, vector<8x16xf32>,
    %cst = arith.constant 0.000000e+00 : f32
    %4 = vector.broadcast %cst : f32 to vector<24x16xf32>
    %c0_6 = arith.constant 0 : index
    %c0_7 = arith.constant 0 : index
    %5 = vector.load %arg14[%c0_6, %c0_7] : memref<32x16xf32, #tpu.memory_space<vmem>>, vector<24x16xf32>
    %c0_8 = arith.constant 0 : index
    %c0_9 = arith.constant 0 : index
    %c0_10 = arith.constant 0 : index
    %6 = vector.load %arg3[%c0_8, %c0_9, %c0_10] : memref<5x16x16xf32, #tpu.memory_space<vmem>>, vector<1x16x16xf32>
    %7 = vector.shape_cast %6 : vector<1x16x16xf32> to vector<16x16xf32>
    %cst_11 = arith.constant dense<0.000000e+00> : vector<24x16xf32>
    %8 = tpu.matmul %5, %7, %cst_11 {dimension_numbers = #tpu.dot_dimension_numbers<[1], [0], [0], [1], [0, 0, 1, 1], [], []>} : vector<24x16xf32>, vector<16x16xf32>, vector<24x16xf32> -> vector<24x16xf32>
    %9 = arith.addf %4, %8 : vector<24x16xf32>
    %c2 = arith.constant 2 : index
    %c0_12 = arith.constant 0 : index
    %10 = vector.load %arg14[%c2, %c0_12] : memref<32x16xf32, #tpu.memory_space<vmem>>, vector<24x16xf32>
    %c1 = arith.constant 1 : index
    %c0_13 = arith.constant 0 : index
    %c0_14 = arith.constant 0 : index
    %11 = vector.load %arg3[%c1, %c0_13, %c0_14] : memref<5x16x16xf32, #tpu.memory_space<vmem>>, vector<1x16x16xf32>
    %12 = vector.shape_cast %11 : vector<1x16x16xf32> to vector<16x16xf32>
    %cst_15 = arith.constant dense<0.000000e+00> : vector<24x16xf32>
    %13 = tpu.matmul %10, %12, %cst_15 {dimension_numbers = #tpu.dot_dimension_numbers<[1], [0], [0], [1], [0, 0, 1, 1], [], []>} : vector<24x16xf32>, vector<16x16xf32>, vector<24x16xf32> -> vector<24x16xf32>
    %14 = arith.addf %9, %13 : vector<24x16xf32>
    %c4 = arith.constant 4 : index
    %c0_16 = arith.constant 0 : index
    %15 = vector.load %arg14[%c4, %c0_16] : memref<32x16xf32, #tpu.memory_space<vmem>>, vector<24x16xf32>
    %c2_17 = arith.constant 2 : index
    %c0_18 = arith.constant 0 : index
    %c0_19 = arith.constant 0 : index
    %16 = vector.load %arg3[%c2_17, %c0_18, %c0_19] : memref<5x16x16xf32, #tpu.memory_space<vmem>>, vector<1x16x16xf32>
    %17 = vector.shape_cast %16 : vector<1x16x16xf32> to vector<16x16xf32>
    %cst_20 = arith.constant dense<0.000000e+00> : vector<24x16xf32>
    %18 = tpu.matmul %15, %17, %cst_20 {dimension_numbers = #tpu.dot_dimension_numbers<[1], [0], [0], [1], [0, 0, 1, 1], [], []>} : vector<24x16xf32>, vector<16x16xf32>, vector<24x16xf32> -> vector<24x16xf32>
    %19 = arith.addf %14, %18 : vector<24x16xf32>
    %c6 = arith.constant 6 : index
    %c0_21 = arith.constant 0 : index
    %20 = vector.load %arg14[%c6, %c0_21] : memref<32x16xf32, #tpu.memory_space<vmem>>, vector<24x16xf32>
    %c3 = arith.constant 3 : index
    %c0_22 = arith.constant 0 : index
    %c0_23 = arith.constant 0 : index
    %21 = vector.load %arg3[%c3, %c0_22, %c0_23] : memref<5x16x16xf32, #tpu.memory_space<vmem>>, vector<1x16x16xf32>
    %22 = vector.shape_cast %21 : vector<1x16x16xf32> to vector<16x16xf32>
    %cst_24 = arith.constant dense<0.000000e+00> : vector<24x16xf32>
    %23 = tpu.matmul %20, %22, %cst_24 {dimension_numbers = #tpu.dot_dimension_numbers<[1], [0], [0], [1], [0, 0, 1, 1], [], []>} : vector<24x16xf32>, vector<16x16xf32>, vector<24x16xf32> -> vector<24x16xf32>
    %24 = arith.addf %19, %23 : vector<24x16xf32>
    %c8 = arith.constant 8 : index
    %c0_25 = arith.constant 0 : index
    %25 = vector.load %arg14[%c8, %c0_25] : memref<32x16xf32, #tpu.memory_space<vmem>>, vector<24x16xf32>
    %c4_26 = arith.constant 4 : index
    %c0_27 = arith.constant 0 : index
    %c0_28 = arith.constant 0 : index
    %26 = vector.load %arg3[%c4_26, %c0_27, %c0_28] : memref<5x16x16xf32, #tpu.memory_space<vmem>>, vector<1x16x16xf32>
    %27 = vector.shape_cast %26 : vector<1x16x16xf32> to vector<16x16xf32>
    %cst_29 = arith.constant dense<0.000000e+00> : vector<24x16xf32>
    %28 = tpu.matmul %25, %27, %cst_29 {dimension_numbers = #tpu.dot_dimension_numbers<[1], [0], [0], [1], [0, 0, 1, 1], [], []>} : vector<24x16xf32>, vector<16x16xf32>, vector<24x16xf32> -> vector<24x16xf32>
    %29 = arith.addf %24, %28 : vector<24x16xf32>
    %c0_30 = arith.constant 0 : index
    %c0_31 = arith.constant 0 : index
    %30 = vector.load %arg4[%c0_30, %c0_31] : memref<1x16xf32, #tpu.memory_space<vmem>>, vector<1x16xf32>
    %31 = vector.broadcast %30 : vector<1x16xf32> to vector<24x16xf32>
    %32 = arith.addf %29, %31 : vector<24x16xf32>
    %cst_32 = arith.constant 0.000000e+00 : f32
    %33 = vector.broadcast %cst_32 : f32 to vector<24x16xf32>
    %34 = arith.maximumf %32, %33 : vector<24x16xf32>
    %c8_33 = arith.constant 8 : index
    %c0_34 = arith.constant 0 : index
    %35 = vector.load %arg1[%c8_33, %c0_34] : memref<24x16xf32, #tpu.memory_space<vmem>>, vector<16x16xf32>
    %c0_35 = arith.constant 0 : index
    %c0_36 = arith.constant 0 : index
    %36 = vector.load %arg2[%c0_35, %c0_36] : memref<8x16xf32, #tpu.memory_space<vmem>>, vector<8x16xf32>
    %37 = tpu.concatenate %35, %36 in 0 : vector<16x16xf32>, vector<8x16xf32> -> vector<24x16xf32>
    %38 = arith.addf %34, %37 : vector<24x16xf32>
    %cst_37 = arith.constant dense<0.000000e+00> : vector<24xf32>
    %39 = vector.multi_reduction <add>, %38, %cst_37 [1] : vector<24x16xf32> to vector<24xf32>
    %40 = vector.shape_cast %39 : vector<24xf32> to vector<24x1xf32>
    %cst_38 = arith.constant 1.600000e+01 : f32
    %41 = vector.broadcast %cst_38 : f32 to vector<24x1xf32>
    %42 = arith.divf %40, %41 : vector<24x1xf32>
    %43 = vector.broadcast %42 : vector<24x1xf32> to vector<24x16xf32>
    %44 = arith.subf %38, %43 : vector<24x16xf32>
    %45 = arith.mulf %44, %44 : vector<24x16xf32>
    %cst_39 = arith.constant dense<0.000000e+00> : vector<24xf32>
    %46 = vector.multi_reduction <add>, %45, %cst_39 [1] : vector<24x16xf32> to vector<24xf32>
    %47 = vector.shape_cast %46 : vector<24xf32> to vector<24x1xf32>
    %cst_40 = arith.constant 1.600000e+01 : f32
    %48 = vector.broadcast %cst_40 : f32 to vector<24x1xf32>
    %49 = arith.divf %47, %48 : vector<24x1xf32>
    %cst_41 = arith.constant 9.99999974E-6 : f32
    %50 = vector.broadcast %cst_41 : f32 to vector<24x1xf32>
    %51 = arith.addf %49, %50 : vector<24x1xf32>
    %52 = math.rsqrt %51 : vector<24x1xf32>
    %53 = vector.broadcast %52 : vector<24x1xf32> to vector<24x16xf32>
    %54 = arith.mulf %44, %53 : vector<24x16xf32>
    %c0_42 = arith.constant 0 : index
    %c0_43 = arith.constant 0 : index
    %55 = vector.load %arg5[%c0_42, %c0_43] : memref<1x16xf32, #tpu.memory_space<vmem>>, vector<1x16xf32>
    %56 = vector.broadcast %55 : vector<1x16xf32> to vector<24x16xf32>
    %57 = arith.mulf %54, %56 : vector<24x16xf32>
    %c0_44 = arith.constant 0 : index
    %c0_45 = arith.constant 0 : index
    %58 = vector.load %arg6[%c0_44, %c0_45] : memref<1x16xf32, #tpu.memory_space<vmem>>, vector<1x16xf32>
    %59 = vector.broadcast %58 : vector<1x16xf32> to vector<24x16xf32>
    %60 = arith.addf %57, %59 : vector<24x16xf32>
    %c0_46 = arith.constant 0 : index
    %c0_47 = arith.constant 0 : index
    %61 = vector.load %arg7[%c0_46, %c0_47] : memref<16x16xf32, #tpu.memory_space<vmem>>, vector<16x16xf32>
    %cst_48 = arith.constant dense<0.000000e+00> : vector<24x16xf32>
    %62 = tpu.matmul %60, %61, %cst_48 {dimension_numbers = #tpu.dot_dimension_numbers<[1], [0], [0], [1], [0, 0, 1, 1], [], []>} : vector<24x16xf32>, vector<16x16xf32>, vector<24x16xf32> -> vector<24x16xf32>
    %c0_49 = arith.constant 0 : index
    %c0_50 = arith.constant 0 : index
    %63 = vector.load %arg8[%c0_49, %c0_50] : memref<1x16xf32, #tpu.memory_space<vmem>>, vector<1x16xf32>
    %64 = vector.broadcast %63 : vector<1x16xf32> to vector<24x16xf32>
    %65 = arith.addf %62, %64 : vector<24x16xf32>
    %cst_51 = arith.constant 0.000000e+00 : f32
    %66 = vector.broadcast %cst_51 : f32 to vector<24x16xf32>
    %67 = arith.maximumf %65, %66 : vector<24x16xf32>
    %c0_52 = arith.constant 0 : index
    %c0_53 = arith.constant 0 : index
    %68 = vector.load %arg9[%c0_52, %c0_53] : memref<16x16xf32, #tpu.memory_space<vmem>>, vector<16x16xf32>
    %cst_54 = arith.constant dense<0.000000e+00> : vector<24x16xf32>
    %69 = tpu.matmul %67, %68, %cst_54 {dimension_numbers = #tpu.dot_dimension_numbers<[1], [0], [0], [1], [0, 0, 1, 1], [], []>} : vector<24x16xf32>, vector<16x16xf32>, vector<24x16xf32> -> vector<24x16xf32>
    %c0_55 = arith.constant 0 : index
    %c0_56 = arith.constant 0 : index
    %70 = vector.load %arg10[%c0_55, %c0_56] : memref<1x16xf32, #tpu.memory_space<vmem>>, vector<1x16xf32>
    %71 = vector.broadcast %70 : vector<1x16xf32> to vector<24x16xf32>
    %72 = arith.addf %69, %71 : vector<24x16xf32>
    %73 = arith.addf %72, %60 : vector<24x16xf32>
    %cst_57 = arith.constant dense<0.000000e+00> : vector<24xf32>
    %74 = vector.multi_reduction <add>, %73, %cst_57 [1] : vector<24x16xf32> to vector<24xf32>
    %75 = vector.shape_cast %74 : vector<24xf32> to vector<24x1xf32>
    %cst_58 = arith.constant 1.600000e+01 : f32
    %76 = vector.broadcast %cst_58 : f32 to vector<24x1xf32>
    %77 = arith.divf %75, %76 : vector<24x1xf32>
    %78 = vector.broadcast %77 : vector<24x1xf32> to vector<24x16xf32>
    %79 = arith.subf %73, %78 : vector<24x16xf32>
    %80 = arith.mulf %79, %79 : vector<24x16xf32>
    %cst_59 = arith.constant dense<0.000000e+00> : vector<24xf32>
    %81 = vector.multi_reduction <add>, %80, %cst_59 [1] : vector<24x16xf32> to vector<24xf32>
    %82 = vector.shape_cast %81 : vector<24xf32> to vector<24x1xf32>
    %cst_60 = arith.constant 1.600000e+01 : f32
    %83 = vector.broadcast %cst_60 : f32 to vector<24x1xf32>
    %84 = arith.divf %82, %83 : vector<24x1xf32>
    %cst_61 = arith.constant 9.99999974E-6 : f32
    %85 = vector.broadcast %cst_61 : f32 to vector<24x1xf32>
    %86 = arith.addf %84, %85 : vector<24x1xf32>
    %87 = math.rsqrt %86 : vector<24x1xf32>
    %88 = vector.broadcast %87 : vector<24x1xf32> to vector<24x16xf32>
    %89 = arith.mulf %79, %88 : vector<24x16xf32>
    %c0_62 = arith.constant 0 : index
    %c0_63 = arith.constant 0 : index
    %90 = vector.load %arg11[%c0_62, %c0_63] : memref<1x16xf32, #tpu.memory_space<vmem>>, vector<1x16xf32>
    %91 = vector.broadcast %90 : vector<1x16xf32> to vector<24x16xf32>
    %92 = arith.mulf %89, %91 : vector<24x16xf32>
    %c0_64 = arith.constant 0 : index
    %c0_65 = arith.constant 0 : index
    %93 = vector.load %arg12[%c0_64, %c0_65] : memref<1x16xf32, #tpu.memory_space<vmem>>, vector<1x16xf32>
    %94 = vector.broadcast %93 : vector<1x16xf32> to vector<24x16xf32>
    %95 = arith.addf %92, %94 : vector<24x16xf32>
    %c0_66 = arith.constant 0 : index
    %c0_67 = arith.constant 0 : index
    %96 = vector.load %arg13[%c0_66, %c0_67] : memref<24x16xf32, #tpu.memory_space<vmem>>, vector<24x16xf32>
    tpu.vector_store %arg13[%c0_66, %c0_67], %95 {strides = array<i32>} : memref<24x16xf32, #tpu.memory_space<vmem>>, vector<24x16xf32>,
    return
  }
  func.func @transform_0(%arg0: i32) -> (i32, i32) {
    %c0_i32 = arith.constant 0 : i32
    %c0_i32_0 = arith.constant 0 : i32
    return %arg0, %c0_i32 : i32, i32
  }
  func.func @transform_1(%arg0: i32) -> (i32, i32) {
    %c1_i32 = arith.constant 1 : i32
    %0 = arith.addi %arg0, %c1_i32 : i32
    %c3_i32 = arith.constant 3 : i32
    %1 = arith.muli %0, %c3_i32 : i32
    %c0_i32 = arith.constant 0 : i32
    %c0_i32_0 = arith.constant 0 : i32
    return %1, %c0_i32 : i32, i32
  }
  func.func @transform_2(%arg0: i32) -> (i32, i32, i32) {
    %c0_i32 = arith.constant 0 : i32
    %c0_i32_0 = arith.constant 0 : i32
    %c0_i32_1 = arith.constant 0 : i32
    %c0_i32_2 = arith.constant 0 : i32
    return %c0_i32, %c0_i32_0, %c0_i32_1 : i32, i32, i32
  }
  func.func @transform_3(%arg0: i32) -> (i32, i32) {
    %c0_i32 = arith.constant 0 : i32
    %c0_i32_0 = arith.constant 0 : i32
    %c0_i32_1 = arith.constant 0 : i32
    return %c0_i32, %c0_i32_0 : i32, i32
  }
  func.func @transform_4(%arg0: i32) -> (i32, i32) {
    %c0_i32 = arith.constant 0 : i32
    %c0_i32_0 = arith.constant 0 : i32
    %c0_i32_1 = arith.constant 0 : i32
    return %c0_i32, %c0_i32_0 : i32, i32
  }
  func.func @transform_5(%arg0: i32) -> (i32, i32) {
    %c0_i32 = arith.constant 0 : i32
    %c0_i32_0 = arith.constant 0 : i32
    %c0_i32_1 = arith.constant 0 : i32
    return %c0_i32, %c0_i32_0 : i32, i32
  }
  func.func @transform_6(%arg0: i32) -> (i32, i32) {
    %c0_i32 = arith.constant 0 : i32
    %c0_i32_0 = arith.constant 0 : i32
    %c0_i32_1 = arith.constant 0 : i32
    return %c0_i32, %c0_i32_0 : i32, i32
  }
  func.func @transform_7(%arg0: i32) -> (i32, i32) {
    %c0_i32 = arith.constant 0 : i32
    %c0_i32_0 = arith.constant 0 : i32
    %c0_i32_1 = arith.constant 0 : i32
    return %c0_i32, %c0_i32_0 : i32, i32
  }
  func.func @transform_8(%arg0: i32) -> (i32, i32) {
    %c0_i32 = arith.constant 0 : i32
    %c0_i32_0 = arith.constant 0 : i32
    %c0_i32_1 = arith.constant 0 : i32
    return %c0_i32, %c0_i32_0 : i32, i32
  }
  func.func @transform_9(%arg0: i32) -> (i32, i32) {
    %c0_i32 = arith.constant 0 : i32
    %c0_i32_0 = arith.constant 0 : i32
    %c0_i32_1 = arith.constant 0 : i32
    return %c0_i32, %c0_i32_0 : i32, i32
  }
  func.func @transform_10(%arg0: i32) -> (i32, i32) {
    %c0_i32 = arith.constant 0 : i32
    %c0_i32_0 = arith.constant 0 : i32
    %c0_i32_1 = arith.constant 0 : i32
    return %c0_i32, %c0_i32_0 : i32, i32
  }
  func.func @transform_11(%arg0: i32) -> (i32, i32) {
    %c0_i32 = arith.constant 0 : i32
    %c0_i32_0 = arith.constant 0 : i32
    %c0_i32_1 = arith.constant 0 : i32
    return %c0_i32, %c0_i32_0 : i32, i32
  }
  func.func @transform_12(%arg0: i32) -> (i32, i32) {
    %c0_i32 = arith.constant 0 : i32
    %c0_i32_0 = arith.constant 0 : i32
    return %arg0, %c0_i32 : i32, i32
  }
}

</mosaic_0001>

<bundles_post_ra>
// kernel: tpu_custom_call.1
= control target key start
LH: loop header
LB: loop body
LE: loop exit
PB: predicated region body
PF: predicated region fallthrough
CT: control target
= control target key end

     0   :  { %17 = vsyncpa [#allocation4], 0  ;;  %s1148_s21 = smov [#allocation3]   ;;  %s1404_s0 = inlined_call_operand.vmem [shape: f32[32,16], index: 0, kind: input, shape index: {}]   ;;  %s1405_s1 = inlined_call_operand.vmem [shape: f32[32,16], index: 1, kind: input, shape index: {}]   ;;  %s1406_s2 = inlined_call_operand.vmem [shape: f32[5,16,16], index: 2, kind: input, shape index: {}]   ;;  %s1407_s3 = inlined_call_operand.vmem [shape: f32[1,16], index: 3, kind: input, shape index: {}]   ;;  %s1408_s4 = inlined_call_operand.vmem [shape: f32[1,16], index: 4, kind: input, shape index: {}]   ;;  %s1409_s5 = inlined_call_operand.hbm [shape: f32[1,16], index: 5, kind: input, shape index: {}]   ;;  %s1410_s6 = inlined_call_operand.vmem [shape: f32[16,16], index: 6, kind: input, shape index: {}]   ;;  %s1411_s7 = inlined_call_operand.vmem [shape: f32[1,16], index: 7, kind: input, shape index: {}]   ;;  %s1412_s8 = inlined_call_operand.vmem [shape: f32[16,16], index: 8, kind: input, shape index: {}]   ;;  %s1413_s9 = inlined_call_operand.vmem [shape: f32[1,16], index: 9, kind: input, shape index: {}]   ;;  %s1414_s10 = inlined_call_operand.vmem [shape: f32[1,16], index: 10, kind: input, shape index: {}]   ;;  %s1415_s11 = inlined_call_operand.vmem [shape: f32[1,16], index: 11, kind: input, shape index: {}]   ;;  %s1416_s12 = inlined_call_operand.vmem [shape: f32[24,16], index: 12, kind: output, shape index: {}]  }
   0x1   :  { %s42_s22 = sshll.u32 %s1148_s21, 4  ;;  %s1124_s25 = scalar_lea.hbm %s1409_s5, 16  ;;  %s43_s22 = int_to_ptr.vmem [resolvable:$true] %s42_s22 }
   0x2   :  { %p1125_p0 = scmp.ne.s32.totalorder %s1409_s5, %s1124_s25  ;;  %p1128_p1 = scmp.lt.u32.totalorder %s1124_s25, %s1409_s5 }
   0x4   :  { %p1130_p2 = pnand %p1128_p1, %p1125_p0 }
   0x6   :  { %1133 = shalt.err (!%p1130_p2)
}
   0x7   :  { %s1134_s30 = scalar_lea.vmem %s43_s22, 16  ;;  %s1138_s13 = scalar_lea.vmem %s43_s22, 32 }
   0x8   :  { %p1135_p3 = scmp.ne.s32.totalorder %s43_s22, %s1134_s30  ;;  %p1139_p4 = scmp.lt.s32.totalorder %s43_s22, %s43_s22 }
   0x9   :  { %p1140_p5 = scmp.lt.s32.totalorder %s1138_s13, %s1134_s30 }
   0xb   :  { %p1141_p6 = por %p1140_p5, %p1139_p4 }
   0xd   :  { %p1142_p7 = pnand %p1141_p6, %p1135_p3 }
   0xf   :  { %1145 = shalt.err (!%p1142_p7)
}
  0x10   :  { %45 = dma.hbm_to_vmem [thread:$0]  %s1409_s5, 16, %s43_s22, [#allocation4]  }
  0x11   :  { %1146 = dma.done.wait [#allocation4], 16  }
  0x12   :  { %1147 = vsyncadd [#allocation4], 4294967280  ;;  %v1149_v0 = vmov 0.0|0.0   ;;  %vm1150_vm0 = vmmov 0   ;;  %v1151_v1 = vmov 0.0   ;;  %vm78_vm1 = vcmask 130048  }
  0x13   :  { %1106 = vmatprep.subr.bf16.mxu1 %v1149_v0  ;;  %1001 = vmatprep.mubr.msk.f32.mxu1 %vm1150_vm0, %v1151_v1  ;;  %v922_v2 = vld [vmem:[%s1406_s2 + $0x10] sm:$0xff]  ;;  %v923_v3 = vld [vmem:[%s1406_s2 + $0x18] sm:$0xff]  ;;  %v1242_v4 = vld [vmem:[%s1404_s0 + $0x8] sm:$0xff] }
  0x14   :  { %1085 = vmatprep.subr.bf16.mxu0 %v1149_v0  ;;  %998 = vmatprep.mubr.msk.f32.mxu0 %vm1150_vm0, %v1151_v1  ;;  %v1086_v5 = vpack.c.bf16 %v923_v3, %v922_v2  ;;  %v1247_v6 = vld [vmem:[%s1404_s0 + $0x10] sm:$0xff]  ;;  %80 = vst.msk [vmem:[#allocation2 + $0x8] sm:$0xff] %vm78_vm1, %v1242_v4  ;;  %v1256_v7 = vld [vmem:[%s1405_s1 + $0x18] sm:$0xff]  ;;  %v75_v8 = vld [vmem:[%s1404_s0] sm:$0xff] }
  0x15   :  { %81 = vst.msk [vmem:[#allocation2 + $0x10] sm:$0xff] %vm78_vm1, %v1247_v6  ;;  %83 = vst.msk [vmem:[#allocation2 + $0x18] sm:$0xff] %vm78_vm1, %v1256_v7  ;;  %v87_v9 = vld [vmem:[%s1406_s2] sm:$0xff]  ;;  %v88_v10 = vld [vmem:[%s1406_s2 + $0x8] sm:$0xff] }
  0x16   :  { %1107 = vmatpush3.bf16.msra.mxu1 %v1086_v5  ;;  %1087 = vmatpush3.bf16.msra.mxu0 %v1086_v5  ;;  %79 = vst.msk [vmem:[#allocation2] sm:$0xff] %vm78_vm1, %v75_v8  ;;  %v930_v11 = vld [vmem:[%s1406_s2 + $0x20] sm:$0xff]  ;;  %v931_v12 = vld [vmem:[%s1406_s2 + $0x28] sm:$0xff]  ;;  %v1089_v13 = vpack.c.bf16 %v88_v10, %v87_v9  ;;  %v935_v20 = vld [vmem:[%s1406_s2 + $0x30] sm:$0xff] }
  0x17   :  { %1088 = vmatprep.subr.bf16.mxu1 %v1149_v0  ;;  %1091 = vmatprep.subr.bf16.mxu0 %v1149_v0  ;;  %v1092_v15 = vpack.c.bf16 %v931_v12, %v930_v11  ;;  %v940_v17 = vld [vmem:[%s1406_s2 + $0x40] sm:$0xff]  ;;  %v941_v18 = vld [vmem:[%s1406_s2 + $0x48] sm:$0xff]  ;;  %v936_v21 = vld [vmem:[%s1406_s2 + $0x38] sm:$0xff] }
  0x18   :  { %v1098_v23 = vpack.c.bf16 %v941_v18, %v940_v17  ;;  %v1095_v25 = vpack.c.bf16 %v936_v21, %v935_v20  ;;  %v945_v63 = vld [vmem:[%s1407_s3] ss:$0 sm:$0xff] }
  0x1b   :  { %v85_v27 = vld [vmem:[#allocation2 + $0x8] sm:$0xff] }
  0x1c   :  { %v90_v14 = vld [vmem:[#allocation2 + $0xa] sm:$0xff]  ;;  %v91_v19 = vld [vmem:[#allocation2 + $0x12] sm:$0xff] }
  0x1d   :  { %1002 = vmatmul.mubr.msk.f32.vlgmr.msra.gmra.mrb[0].mxu1 %vm78_vm1, %v90_v14  ;;  %v89_v16 = vld [vmem:[#allocation2 + $0x2] sm:$0xff]  ;;  %v274_v26 = vld [vmem:[#allocation2 + $0xc] sm:$0xff]  ;;  %v275_v28 = vld [vmem:[#allocation2 + $0x14] sm:$0xff] }
  0x1e   :  { %1090 = vmatpush3.bf16.msra.mxu1 %v1089_v13  ;;  %1004 = vmatprep.mubr.msk.f32.mxu1 %vm1150_vm0, %v1151_v1  ;;  %v273_v22 = vld [vmem:[#allocation2 + $0x4] sm:$0xff]  ;;  %v86_v29 = vld [vmem:[#allocation2 + $0x10] sm:$0xff]  ;;  %v471_v32 = vld [vmem:[#allocation2 + $0x18] sm:$0xff] }
  0x1f   :  { %999 = vmatmul.mubr.msk.f32.vlgmr.msra.gmra.mrb[0].mxu0 %vm78_vm1, %v89_v16  ;;  %1094 = vmatprep.subr.bf16.mxu1 %v1149_v0  ;;  %v84_v24 = vld [vmem:[#allocation2] sm:$0xff]  ;;  %v372_v31 = vld [vmem:[#allocation2 + $0xe] sm:$0xff]  ;;  %v373_v33 = vld [vmem:[#allocation2 + $0x16] sm:$0xff] }
  0x20   :  { %1093 = vmatpush3.bf16.msra.mxu0 %v1092_v15  ;;  %1024 = vmatprep.mubr.msk.f32.mxu0 %vm1150_vm0, %v1151_v1  ;;  %v371_v30 = vld [vmem:[#allocation2 + $0x6] sm:$0xff] }
  0x21   :  { %1005 = vmatmul.mubr.msk.f32.gmra.mrb[2].mxu1 %vm78_vm1, %v91_v19  ;;  %1097 = vmatprep.subr.bf16.mxu0 %v1149_v0 }
  0x22   :  { %1011 = vmatprep.mubr.msk.f32.mxu1 %vm1150_vm0, %v1151_v1 }
  0x23   :  { %1025 = vmatmul.mubr.msk.f32.vlgmr.msra.gmra.mrb[2].mxu0 %vm78_vm1, %v273_v22 }
  0x24   :  { %1099 = vmatpush3.bf16.msra.mxu0 %v1098_v23  ;;  %1027 = vmatprep.mubr.msk.f32.mxu0 %vm1150_vm0, %v1151_v1 }
  0x25   :  { %1012 = vmatmul.mubr.msk.f32.vlgmr.msra.gmra.mrb[4].mxu1 %vm78_vm1, %v84_v24  ;;  %1103 = vmatprep.subr.bf16.mxu0 %v1149_v0 }
  0x26   :  { %1096 = vmatpush3.bf16.msra.mxu1 %v1095_v25  ;;  %1014 = vmatprep.mubr.msk.f32.mxu1 %vm1150_vm0, %v1151_v1 }
  0x27   :  { %1028 = vmatmul.mubr.msk.f32.gmra.mrb[4].mxu0 %vm78_vm1, %v274_v26  ;;  %1100 = vmatprep.subr.bf16.mxu1 %v1149_v0 }
  0x28   :  { %1030 = vmatprep.mubr.msk.f32.mxu0 %vm1150_vm0, %v1151_v1 }
  0x29   :  { %1015 = vmatmul.mubr.msk.f32.gmra.mrb[6].mxu1 %vm78_vm1, %v85_v27 }
  0x2a   :  { %1017 = vmatprep.mubr.msk.f32.mxu1 %vm1150_vm0, %v1151_v1 }
  0x2b   :  { %1031 = vmatmul.mubr.msk.f32.gmra.mrb[6].mxu0 %vm78_vm1, %v275_v28 }
  0x2c   :  { %1050 = vmatprep.mubr.msk.f32.mxu0 %vm1150_vm0, %v1151_v1 }
  0x2d   :  { %1018 = vmatmul.mubr.msk.f32.gmra.mrb[8].mxu1 %vm78_vm1, %v86_v29 }
  0x2e   :  { %1037 = vmatprep.mubr.msk.f32.mxu1 %vm1150_vm0, %v1151_v1 }
  0x2f   :  { %1051 = vmatmul.mubr.msk.f32.vlgmr.msra.gmra.mrb[8].mxu0 %vm78_vm1, %v85_v27 }
  0x30   :  { %1053 = vmatprep.mubr.msk.f32.mxu0 %vm1150_vm0, %v1151_v1 }
  0x31   :  { %1038 = vmatmul.mubr.msk.f32.vlgmr.msra.gmra.mrb[10].mxu1 %vm78_vm1, %v371_v30 }
  0x32   :  { %1040 = vmatprep.mubr.msk.f32.mxu1 %vm1150_vm0, %v1151_v1 }
  0x33   :  { %1054 = vmatmul.mubr.msk.f32.gmra.mrb[10].mxu0 %vm78_vm1, %v86_v29 }
  0x34   :  { %1056 = vmatprep.mubr.msk.f32.mxu0 %vm1150_vm0, %v1151_v1 }
  0x35   :  { %1041 = vmatmul.mubr.msk.f32.gmra.mrb[12].mxu1 %vm78_vm1, %v372_v31 }
  0x36   :  { %1043 = vmatprep.mubr.msk.f32.mxu1 %vm1150_vm0, %v1151_v1 }
  0x37   :  { %1057 = vmatmul.mubr.msk.f32.gmra.mrb[12].mxu0 %vm78_vm1, %v471_v32 }
  0x38   :  { %1076 = vmatprep.mubr.msk.f32.mxu0 %vm1150_vm0, %v1151_v1 }
  0x39   :  { %1044 = vmatmul.mubr.msk.f32.gmra.mrb[14].mxu1 %vm78_vm1, %v373_v33 }
  0x3a   :  { %1063 = vmatprep.mubr.msk.f32.mxu1 %vm1150_vm0, %v1151_v1 }
  0xf0   :  { %v175_v34 = vpop.f32.mrb[0].mxu1 }
  0xf1   :  { %v1003_v35 = vpop.f32.mrb[1].mxu1 }
  0xf2   :  { %v170_v36 = vpop.f32.mrb[0].mxu0 }
  0xf3   :  { %v1000_v37 = vpop.f32.mrb[1].mxu0 }
  0xf4   :  { %v180_v38 = vpop.f32.mrb[2].mxu1 }
  0xf5   :  { %v1006_v39 = vpop.f32.mrb[3].mxu1 }
  0xf6   :  { %v354_v40 = vpop.f32.mrb[2].mxu0 }
  0xf7   :  { %v1026_v41 = vpop.f32.mrb[3].mxu0 }
  0xf8   :  { %v259_v42 = vpop.f32.mrb[4].mxu1  ;;  %v646_v41 = vld [vmem:[%s1410_s6] sm:$0xff] }
  0xf9   :  { %v260_v43 = vadd.f32 %v259_v42, %v170_v36  ;;  %v1013_v44 = vpop.f32.mrb[5].mxu1  ;;  %v647_v42 = vld [vmem:[%s1410_s6 + $0x8] sm:$0xff] }
  0xfa   :  { %v359_v45 = vpop.f32.mrb[4].mxu0  ;;  %v747_v44 = vld [vmem:[%s1412_s8] sm:$0xff] }
  0xfb   :  { %v368_v46 = vadd.f32 %v354_v40, %v260_v43  ;;  %v1029_v47 = vpop.f32.mrb[5].mxu0  ;;  %v1101_v43 = vpack.c.bf16 %v647_v42, %v646_v41 }
  0xfc   :  { %v264_v48 = vpop.f32.mrb[6].mxu1 }
  0xfd   :  { %v265_v49 = vadd.f32 %v264_v48, %v175_v34  ;;  %v1016_v50 = vpop.f32.mrb[7].mxu1  ;;  %1102 = vmatpush3.bf16.msra.mxu1 %v1101_v43 }
  0xfe   :  { %v364_v51 = vpop.f32.mrb[6].mxu0 }
  0xff   :  { %v369_v52 = vadd.f32 %v359_v45, %v265_v49  ;;  %v1032_v53 = vpop.f32.mrb[7].mxu0  ;;  %v748_v45 = vld [vmem:[%s1412_s8 + $0x8] sm:$0xff] }
 0x100   :  { %v269_v54 = vpop.f32.mrb[8].mxu1 }
 0x101   :  { %v270_v55 = vadd.f32 %v269_v54, %v180_v38  ;;  %v1019_v56 = vpop.f32.mrb[9].mxu1 }
 0x102   :  { %v550_v57 = vpop.f32.mrb[8].mxu0 }
 0x103   :  { %v370_v58 = vadd.f32 %v364_v51, %v270_v55  ;;  %v1052_v59 = vpop.f32.mrb[9].mxu0 }
 0x104   :  { %v452_v60 = vpop.f32.mrb[10].mxu1  ;;  %v948_v59 = vld [vmem:[#allocation3] ss:$0 sm:$0xff] }
 0x105   :  { %v466_v61 = vadd.f32 %v452_v60, %v368_v46  ;;  %v1039_v62 = vpop.f32.mrb[11].mxu1  ;;  %v1104_v46 = vpack.c.bf16 %v748_v45, %v747_v44 }
 0x106   :  { %v555_v0 = vpop.f32.mrb[10].mxu0 }
 0x107   :  { %v564_v2 = vadd.f32 %v550_v57, %v466_v61  ;;  %v1055_v3 = vpop.f32.mrb[11].mxu0  ;;  %1105 = vmatpush3.bf16.msra.mxu0 %v1104_v46  ;;  %v947_v57 = vld [vmem:[%s1408_s4] ss:$0 sm:$0xff] }
 0x108   :  { %v457_v5 = vpop.f32.mrb[12].mxu1 }
 0x109   :  { %v574_v8 = vadd.f32 %v945_v63, %v564_v2  ;;  %v467_v9 = vadd.f32 %v457_v5, %v369_v52  ;;  %v1042_v10 = vpop.f32.mrb[13].mxu1 }
 0x10a   :  { %v560_v11 = vpop.f32.mrb[12].mxu0  ;;  %v949_v10 = vld [vmem:[%s1411_s7] ss:$0 sm:$0xff] }
 0x10b   :  { %v577_v12 = vmax.f32 %v574_v8, 0.0  ;;  %v565_v13 = vadd.f32 %v555_v0, %v467_v9  ;;  %v1058_v14 = vpop.f32.mrb[13].mxu0 }
 0x10c   :  { %v462_v15 = vpop.f32.mrb[14].mxu1 }
 0x10d   :  { %v575_v16 = vadd.f32 %v945_v63, %v565_v13  ;;  %v468_v17 = vadd.f32 %v462_v15, %v370_v58  ;;  %v1045_v18 = vpop.f32.mrb[15].mxu1  ;;  %v583_v19 = vadd.f32 %v577_v12, %v1242_v4 }
 0x10f   :  { %v578_v20 = vmax.f32 %v575_v16, 0.0  ;;  %v566_v21 = vadd.f32 %v560_v11, %v468_v17  ;;  %v586_v22 = vsel %vm78_vm1, %v583_v19, 0.0 }
 0x110   :  { %587 = vadd.xlane.f32.xlu0 %v586_v22 }
 0x111   :  { %v576_v23 = vadd.f32 %v945_v63, %v566_v21  ;;  %v584_v24 = vadd.f32 %v578_v20, %v1247_v6 }
 0x113   :  { %v579_v25 = vmax.f32 %v576_v23, 0.0  ;;  %v589_v26 = vsel %vm78_vm1, %v584_v24, 0.0  ;;  %v953_v23 = vld [vmem:[%s1413_s9] ss:$0 sm:$0xff] }
 0x114   :  { %590 = vadd.xlane.f32.xlu0 %v589_v26 }
 0x115   :  { %v585_v27 = vadd.f32 %v1256_v7, %v579_v25 }
 0x117   :  { %v592_v28 = vsel %vm78_vm1, %v585_v27, 0.0 }
 0x118   :  { %593 = vadd.xlane.f32.xlu1 %v592_v28 }
 0x19d   :  { %v588_v29 = vpop.xlane.xlu0 %587 }
 0x19e   :  { %v596_v30 = vmul.f32 0.0625, %v588_v29 }
 0x1a0   :  { %v599_v4 = vsub.f32 %v583_v19, %v596_v30 }
 0x1a1   :  { %v591_v31 = vpop.xlane.xlu0 %590 }
 0x1a2   :  { %v597_v32 = vmul.f32 0.0625, %v591_v31  ;;  %v602_v33 = vmul.f32 %v599_v4, %v599_v4 }
 0x1a4   :  { %v600_v34 = vsub.f32 %v584_v24, %v597_v32  ;;  %v605_v35 = vsel %vm78_vm1, %v602_v33, 0.0 }
 0x1a5   :  { %606 = vadd.xlane.f32.xlu1 %v605_v35  ;;  %v594_v6 = vpop.xlane.xlu1 %593 }
 0x1a6   :  { %v598_v36 = vmul.f32 0.0625, %v594_v6  ;;  %v603_v37 = vmul.f32 %v600_v34, %v600_v34 }
 0x1a8   :  { %v601_v38 = vsub.f32 %v585_v27, %v598_v36  ;;  %v608_v39 = vsel %vm78_vm1, %v603_v37, 0.0 }
 0x1a9   :  { %609 = vadd.xlane.f32.xlu0 %v608_v39 }
 0x1aa   :  { %v604_v7 = vmul.f32 %v601_v38, %v601_v38 }
 0x1ac   :  { %v611_v40 = vsel %vm78_vm1, %v604_v7, 0.0 }
 0x1ad   :  { %612 = vadd.xlane.f32.xlu1 %v611_v40 }
 0x232   :  { %v607_v47 = vpop.xlane.xlu1 %606 }
 0x233   :  { %v614_v48 = vmul.f32 0.0625, %v607_v47 }
 0x235   :  { %v617_v49 = vadd.f32 1e-05, %v614_v48 }
 0x236   :  { %v610_v50 = vpop.xlane.xlu0 %609 }
 0x237   :  { %1112 = vrsqrt.f32 %v617_v49  ;;  %v615_v51 = vmul.f32 0.0625, %v610_v50 }
 0x239   :  { %v618_v52 = vadd.f32 1e-05, %v615_v51 }
 0x23a   :  { %v613_v53 = vpop.xlane.xlu1 %612 }
 0x23b   :  { %1114 = vrsqrt.f32 %v618_v52  ;;  %v616_v54 = vmul.f32 0.0625, %v613_v53 }
 0x23d   :  { %v619_v55 = vadd.f32 1e-05, %v616_v54 }
 0x23f   :  { %1116 = vrsqrt.f32 %v619_v55 }
 0x241   :  { %v1113_v56 = vpop.eup %1112 }
 0x242   :  { %v623_v58 = vmul.f32 %v1113_v56, %v599_v4 }
 0x244   :  { %v633_v60 = vmul.f32 %v947_v57, %v623_v58 }
 0x245   :  { %v1115_v61 = vpop.eup %1114 }
 0x246   :  { %v643_v62 = vadd.f32 %v948_v59, %v633_v60  ;;  %v624_v63 = vmul.f32 %v1115_v61, %v600_v34  ;;  %v957_v60 = vld [vmem:[%s1414_s10] ss:$0 sm:$0xff] }
 0x248   :  { %1064 = vmatmul.mubr.msk.f32.vlgmr.msra.gmra.mrb[16].mxu1 %vm78_vm1, %v643_v62  ;;  %v634_v0 = vmul.f32 %v947_v57, %v624_v63 }
 0x249   :  { %v1117_v2 = vpop.eup %1116  ;;  %1066 = vmatprep.mubr.msk.f32.mxu1 %vm1150_vm0, %v1151_v1 }
 0x24a   :  { %v644_v3 = vadd.f32 %v948_v59, %v634_v0  ;;  %v625_v5 = vmul.f32 %v1117_v2, %v601_v38 }
 0x24c   :  { %1067 = vmatmul.mubr.msk.f32.gmra.mrb[18].mxu1 %vm78_vm1, %v644_v3  ;;  %v635_v8 = vmul.f32 %v947_v57, %v625_v5 }
 0x24d   :  { %1069 = vmatprep.mubr.msk.f32.mxu1 %vm1150_vm0, %v1151_v1 }
 0x24e   :  { %v645_v9 = vadd.f32 %v948_v59, %v635_v8 }
 0x250   :  { %1070 = vmatmul.mubr.msk.f32.gmra.mrb[20].mxu1 %vm78_vm1, %v645_v9 }
 0x31b   :  { %v730_v11 = vpop.f32.mrb[16].mxu1 }
 0x31c   :  { %v731_v12 = vadd.f32 %v949_v10, %v730_v11  ;;  %v1065_v13 = vpop.f32.mrb[17].mxu1 }
 0x31e   :  { %v744_v14 = vmax.f32 %v731_v12, 0.0 }
 0x31f   :  { %v735_v15 = vpop.f32.mrb[18].mxu1 }
 0x320   :  { %v736_v16 = vadd.f32 %v949_v10, %v735_v15  ;;  %v1068_v17 = vpop.f32.mrb[19].mxu1  ;;  %1077 = vmatmul.mubr.msk.f32.vlgmr.msra.gmra.mrb[14].mxu0 %vm78_vm1, %v744_v14 }
 0x321   :  { %1079 = vmatprep.mubr.msk.f32.mxu0 %vm1150_vm0, %v1151_v1 }
 0x322   :  { %v745_v18 = vmax.f32 %v736_v16, 0.0 }
 0x323   :  { %v740_v19 = vpop.f32.mrb[20].mxu1 }
 0x324   :  { %v741_v20 = vadd.f32 %v949_v10, %v740_v19  ;;  %v1071_v21 = vpop.f32.mrb[21].mxu1  ;;  %1080 = vmatmul.mubr.msk.f32.gmra.mrb[16].mxu0 %vm78_vm1, %v745_v18 }
 0x325   :  { %1082 = vmatprep.mubr.msk.f32.mxu0 %vm1150_vm0, %v1151_v1 }
 0x326   :  { %v746_v22 = vmax.f32 %v741_v20, 0.0 }
 0x328   :  { %1083 = vmatmul.mubr.msk.f32.gmra.mrb[18].mxu0 %vm78_vm1, %v746_v22 }
 0x3f3   :  { %v831_v24 = vpop.f32.mrb[14].mxu0 }
 0x3f4   :  { %v832_v25 = vadd.f32 %v953_v23, %v831_v24  ;;  %v1078_v26 = vpop.f32.mrb[15].mxu0 }
 0x3f6   :  { %v845_v27 = vadd.f32 %v832_v25, %v643_v62  ;;  %v958_v62 = vld [vmem:[%s1415_s11] ss:$0 sm:$0xff] }
 0x3f7   :  { %v836_v28 = vpop.f32.mrb[16].mxu0 }
 0x3f8   :  { %v837_v29 = vadd.f32 %v953_v23, %v836_v28  ;;  %v1081_v30 = vpop.f32.mrb[17].mxu0  ;;  %v848_v4 = vsel %vm78_vm1, %v845_v27, 0.0 }
 0x3f9   :  { %849 = vadd.xlane.f32.xlu0 %v848_v4 }
 0x3fa   :  { %v846_v31 = vadd.f32 %v837_v29, %v644_v3 }
 0x3fb   :  { %v841_v32 = vpop.f32.mrb[18].mxu0 }
 0x3fc   :  { %v842_v1 = vadd.f32 %v953_v23, %v841_v32  ;;  %v1084_v33 = vpop.f32.mrb[19].mxu0  ;;  %v851_v34 = vsel %vm78_vm1, %v846_v31, 0.0 }
 0x3fd   :  { %852 = vadd.xlane.f32.xlu1 %v851_v34 }
 0x3fe   :  { %v847_v35 = vadd.f32 %v842_v1, %v645_v9 }
 0x400   :  { %v854_v6 = vsel %vm78_vm1, %v847_v35, 0.0 }
 0x401   :  { %855 = vadd.xlane.f32.xlu0 %v854_v6 }
 0x486   :  { %v850_v36 = vpop.xlane.xlu0 %849 }
 0x487   :  { %v857_v37 = vmul.f32 0.0625, %v850_v36 }
 0x489   :  { %v860_v38 = vsub.f32 %v845_v27, %v857_v37 }
 0x48a   :  { %v853_v39 = vpop.xlane.xlu1 %852 }
 0x48b   :  { %v858_v7 = vmul.f32 0.0625, %v853_v39  ;;  %v863_v40 = vmul.f32 %v860_v38, %v860_v38 }
 0x48d   :  { %v861_v41 = vsub.f32 %v846_v31, %v858_v7  ;;  %v866_v42 = vsel %vm78_vm1, %v863_v40, 0.0 }
 0x48e   :  { %867 = vadd.xlane.f32.xlu1 %v866_v42  ;;  %v856_v43 = vpop.xlane.xlu0 %855 }
 0x48f   :  { %v859_v44 = vmul.f32 0.0625, %v856_v43  ;;  %v864_v45 = vmul.f32 %v861_v41, %v861_v41 }
 0x491   :  { %v862_v46 = vsub.f32 %v847_v35, %v859_v44  ;;  %v869_v47 = vsel %vm78_vm1, %v864_v45, 0.0 }
 0x492   :  { %870 = vadd.xlane.f32.xlu0 %v869_v47 }
 0x493   :  { %v865_v48 = vmul.f32 %v862_v46, %v862_v46 }
 0x495   :  { %v872_v49 = vsel %vm78_vm1, %v865_v48, 0.0 }
 0x496   :  { %873 = vadd.xlane.f32.xlu1 %v872_v49 }
 0x51b   :  { %v868_v50 = vpop.xlane.xlu1 %867 }
 0x51c   :  { %v875_v51 = vmul.f32 0.0625, %v868_v50 }
 0x51e   :  { %v878_v52 = vadd.f32 1e-05, %v875_v51 }
 0x51f   :  { %v871_v53 = vpop.xlane.xlu0 %870 }
 0x520   :  { %1118 = vrsqrt.f32 %v878_v52  ;;  %v876_v54 = vmul.f32 0.0625, %v871_v53 }
 0x522   :  { %v879_v55 = vadd.f32 1e-05, %v876_v54 }
 0x523   :  { %v874_v56 = vpop.xlane.xlu1 %873 }
 0x524   :  { %1120 = vrsqrt.f32 %v879_v55  ;;  %v877_v57 = vmul.f32 0.0625, %v874_v56 }
 0x526   :  { %v880_v58 = vadd.f32 1e-05, %v877_v57 }
 0x528   :  { %1122 = vrsqrt.f32 %v880_v58 }
 0x52a   :  { %v1119_v59 = vpop.eup %1118 }
 0x52b   :  { %v884_v61 = vmul.f32 %v1119_v59, %v860_v38 }
 0x52d   :  { %v894_v63 = vmul.f32 %v957_v60, %v884_v61 }
 0x52e   :  { %v1121_v0 = vpop.eup %1120 }
 0x52f   :  { %v904_v2 = vadd.f32 %v958_v62, %v894_v63  ;;  %v885_v3 = vmul.f32 %v1121_v0, %v861_v41 }
 0x531   :  { %907 = vst.msk [vmem:[%s1416_s12] sm:$0xff] %vm78_vm1, %v904_v2  ;;  %v895_v5 = vmul.f32 %v957_v60, %v885_v3 }
 0x532   :  { %v1123_v8 = vpop.eup %1122 }
 0x533   :  { %v905_v9 = vadd.f32 %v958_v62, %v895_v5  ;;  %v886_v10 = vmul.f32 %v1123_v8, %v862_v46 }
 0x535   :  { %908 = vst.msk [vmem:[%s1416_s12 + $0x8] sm:$0xff] %vm78_vm1, %v905_v9  ;;  %v896_v11 = vmul.f32 %v957_v60, %v886_v10 }
 0x537   :  { %v906_v12 = vadd.f32 %v958_v62, %v896_v11 }
 0x539   :  { %909 = vst.msk [vmem:[%s1416_s12 + $0x10] sm:$0xff] %vm78_vm1, %v906_v12 }
 0x53a   :  { %914 = vsyncpa [#allocation4], 1 }

</bundles_post_ra>
